<compile_context>
chip_gen: v7x
topology: tpu7x:2x2x1
jax: 0.10.0
libtpu: 0.0.40
codegen_flags: <defaults>
</compile_context>

<pallas_src>
import functools
import math

import jax
import jax.numpy as jnp
from jax import lax
from jax.experimental import pallas as pl
from jax.experimental.pallas import tpu as pltpu


def _round_up(v, m):
    return ((v + m - 1) // m) * m


def _tpu_vmem_bytes():
    """Chip-aware VMEM capacity; conservative (v7x per-TC) fallback."""
    try:
        return int(pltpu.get_tpu_info().vmem_capacity_bytes)
    except Exception:
        return 64 << 20


def _choose_block_rows(n_rows, n_cols, hp, out_bytes, vmem_total):
    """Largest power-of-two row block (<=512) that divides n_rows and whose
    double-buffered adj + out tiles fit the chip-aware VMEM budget after
    subtracting the single-buffered resident support/bias."""
    resident = n_cols * hp * 2 + hp * 4          # bf16 support + f32 bias
    budget = int(vmem_total * 0.70) - resident - (4 << 20)
    blk = 16
    for cand in (512, 256, 128, 64, 32, 16):
        if cand <= n_rows and n_rows % cand == 0:
            tile_bytes = 2 * cand * n_cols * 2 + 2 * cand * hp * out_bytes
            if tile_bytes <= budget:
                blk = cand
                break
    # v7x megacore: make sure the "parallel" axis has >=2 blocks so both
    # TensorCores get work (harmless on v5e/v6e).
    if n_rows // blk < 2 and blk > 16:
        blk //= 2
    return blk


def _spec(shape, index_map, buffers=None):
    """BlockSpec helper; requests explicit buffer depth when supported."""
    if buffers is None:
        return pl.BlockSpec(shape, index_map)
    try:
        return pl.BlockSpec(shape, index_map, pipeline_mode=pl.Buffered(buffers))
    except TypeError:  # older pallas without pipeline_mode kwarg
        return pl.BlockSpec(shape, index_map)


# ---------------------------------------------------------------------------
# Kernels: one grid step = one block of adjacency rows -> one block of output
# rows.  support / bias are small, full-extent, single-buffered residents.
# ---------------------------------------------------------------------------

def _agg_relu_kernel(adj_ref, sup_ref, b_ref, out_ref):
    # h_blk = relu(adj[blk, :] @ support1 + b1)
    h = jnp.dot(adj_ref[...], sup_ref[...], preferred_element_type=jnp.float32)
    h = h + b_ref[...]
    out_ref[...] = jnp.maximum(h, 0.0).astype(out_ref.dtype)


def _agg_logsoftmax_kernel(adj_ref, sup_ref, b_ref, out_ref, *, nclass):
    # z_blk = adj[blk, :] @ support2 + b2 ; out_blk = log_softmax(z_blk, axis=1)
    z = jnp.dot(adj_ref[...], sup_ref[...], preferred_element_type=jnp.float32)
    z = z + b_ref[...]
    # Mask lane-padding columns (class dim padded to 128) so they do not
    # perturb the softmax normalization.
    col = lax.broadcasted_iota(jnp.int32, z.shape, 1)
    z = jnp.where(col < nclass, z, -1e30)
    m = jnp.max(z, axis=1, keepdims=True)
    s = z - m
    lse = jnp.log(jnp.sum(jnp.exp(s), axis=1, keepdims=True))
    out_ref[...] = (s - lse).astype(out_ref.dtype)


def _row_tiled_agg(kernel_fn, adj_bf16, support_bf16, bias_f32, *, blk,
                   out_dtype, flops, transcendentals):
    """Row-tiled, pipelined  out = epilogue(adj @ support + bias)."""
    np_rows, np_cols = adj_bf16.shape
    hp = support_bf16.shape[1]
    out_bytes = jnp.dtype(out_dtype).itemsize
    grid = (np_rows // blk,)

    bytes_accessed = (adj_bf16.size * 2 + support_bf16.size * 2 +
                      bias_f32.size * 4 + np_rows * hp * out_bytes)
    cost = pl.CostEstimate(flops=flops, transcendentals=transcendentals,
                           bytes_accessed=bytes_accessed)

    vmem_total = _tpu_vmem_bytes()
    vmem_est = (2 * blk * np_cols * 2          # adj tile, double-buffered (bf16)
                + np_cols * hp * 2             # support, single-buffered (bf16)
                + hp * 4                       # bias (f32)
                + 2 * blk * hp * out_bytes)    # out tile, double-buffered
    cap = int(vmem_total * 0.75)
    vmem_limit = int(min(max(int(vmem_est * 1.5) + (4 << 20), 16 << 20), cap))

    return pl.pallas_call(
        kernel_fn,
        out_shape=jax.ShapeDtypeStruct((np_rows, hp), out_dtype),
        grid=grid,
        in_specs=[
            _spec((blk, np_cols), lambda i: (i, 0)),            # adj rows (streamed)
            _spec((np_cols, hp), lambda i: (0, 0), buffers=1),  # support (resident)
            _spec((1, hp), lambda i: (0, 0), buffers=1),        # bias (resident)
        ],
        out_specs=pl.BlockSpec((blk, hp), lambda i: (i, 0)),
        compiler_params=pltpu.CompilerParams(
            dimension_semantics=("parallel",),
            vmem_limit_bytes=vmem_limit),
        cost_estimate=cost,
    )(adj_bf16, support_bf16, bias_f32)


def gcn_forward(x, adj, w1, b1, w2, b2):
    """GCN forward: log_softmax(adj @ relu(adj @ (x@W1) + b1) @ W2 + b2, axis=1)."""
    n, nfeat = x.shape
    nhid = w1.shape[1]
    nclass = w2.shape[1]

    # Lane-dense padding: feature dims and N padded only to multiples of 128.
    fp = _round_up(nfeat, 128)
    hp = _round_up(nhid, 128)
    cp = _round_up(nclass, 128)
    np_ = _round_up(n, 128)

    # Row block chosen as a divisor of np_ (no extra square padding of adj).
    vmem_total = _tpu_vmem_bytes()
    blk = _choose_block_rows(np_, np_, max(hp, cp), 4, vmem_total)

    xp = jnp.zeros((np_, fp), jnp.float32).at[:n, :nfeat].set(x)
    # Pad/cast adj directly in bf16 (no full-size f32 intermediate).
    adj_bf16 = (jnp.zeros((np_, np_), jnp.bfloat16)
                .at[:n, :n].set(adj.astype(jnp.bfloat16)))
    w1p = jnp.zeros((fp, hp), jnp.float32).at[:nfeat, :nhid].set(w1)
    b1p = jnp.zeros((1, hp), jnp.float32).at[:, :nhid].set(b1.reshape(1, -1))
    w2p = jnp.zeros((hp, cp), jnp.float32).at[:nhid, :nclass].set(w2)
    b2p = jnp.zeros((1, cp), jnp.float32).at[:, :nclass].set(b2.reshape(1, -1))

    # ---- Layer 1: support1 = x @ W1 (tiny, plain XLA), then row-tiled agg + ReLU.
    #      Output emitted directly in bf16 (only ever consumed as an MXU operand).
    support1 = jnp.dot(xp.astype(jnp.bfloat16), w1p.astype(jnp.bfloat16),
                       preferred_element_type=jnp.float32)
    h = _row_tiled_agg(_agg_relu_kernel, adj_bf16,
                       support1.astype(jnp.bfloat16), b1p, blk=blk,
                       out_dtype=jnp.bfloat16,
                       flops=2 * np_ * np_ * hp, transcendentals=0)

    # Dropout (eval mode): identity.
    # TODO(synk): training-mode dropout via pltpu.prng_seed / prng_random_bits.

    # ---- Layer 2: support2 = h @ W2, then row-tiled agg + log_softmax(dim=1).
    support2 = jnp.dot(h, w2p.astype(jnp.bfloat16),
                       preferred_element_type=jnp.float32)
    out_p = _row_tiled_agg(
        functools.partial(_agg_logsoftmax_kernel, nclass=nclass),
        adj_bf16, support2.astype(jnp.bfloat16), b2p, blk=blk,
        out_dtype=jnp.float32,
        flops=2 * np_ * np_ * cp, transcendentals=np_ * cp)

    return out_p[:n, :nclass]


def gcn_reference(x, adj, w1, b1, w2, b2):
    """Pure-JAX f32 reference matching the PyTorch module (eval mode)."""
    h = jnp.maximum(adj @ (x @ w1) + b1, 0.0)
    z = adj @ (h @ w2) + b2
    return jax.nn.log_softmax(z, axis=1)


def init_gcn_params(key, nfeat, nhid, nclass):
    """Deterministic init mirroring pygcn GraphConvolution.reset_parameters:
    uniform(-stdv, stdv) with stdv = 1/sqrt(out_features)."""
    k1, k2, k3, k4 = jax.random.split(key, 4)
    stdv1 = 1.0 / math.sqrt(nhid)
    stdv2 = 1.0 / math.sqrt(nclass)
    w1 = jax.random.uniform(k1, (nfeat, nhid), jnp.float32, -stdv1, stdv1)
    b1 = jax.random.uniform(k2, (1, nhid), jnp.float32, -stdv1, stdv1)
    w2 = jax.random.uniform(k3, (nhid, nclass), jnp.float32, -stdv2, stdv2)
    b2 = jax.random.uniform(k4, (1, nclass), jnp.float32, -stdv2, stdv2)
    return w1, b1, w2, b2


def make_normalized_adj(key, n):
    """Deterministic symmetric row-normalized adjacency with self-loops."""
    a = (jax.random.uniform(key, (n, n)) > 0.8).astype(jnp.float32)
    a = jnp.maximum(a, a.T) + jnp.eye(n, dtype=jnp.float32)
    deg = jnp.sum(a, axis=1, keepdims=True)
    return a / deg


if __name__ == "__main__":
    # Small shapes: 64 nodes, 32 input features, 16 hidden, 8 classes.
    N, NFEAT, NHID, NCLASS = 64, 32, 16, 8

    key = jax.random.PRNGKey(0)
    kx, kadj, kparam = jax.random.split(key, 3)

    x = jax.random.normal(kx, (N, NFEAT), jnp.float32)
    adj = make_normalized_adj(kadj, N)
    w1, b1, w2, b2 = init_gcn_params(kparam, NFEAT, NHID, NCLASS)

    out = jax.jit(gcn_forward)(x, adj, w1, b1, w2, b2)
    out = jax.block_until_ready(out)

    assert out.shape == (N, NCLASS)

    # log_softmax rows must exponentiate-and-sum to ~1 (normalization is f32).
    row_sums = jnp.sum(jnp.exp(out), axis=1)
    assert bool(jnp.all(jnp.abs(row_sums - 1.0) < 1e-4))

    # Loose agreement with the f32 reference (adj/support fed to MXU in bf16).
    ref = gcn_reference(x, adj, w1, b1, w2, b2)
    assert bool(jnp.max(jnp.abs(out - ref)) < 5e-2)

    print("KERNEL_OK")
</pallas_src>

<mosaic_0001>
module attributes {stable_mosaic.version = 11 : i64} {
  func.func @_agg_relu_kernel(%arg0: i32, %arg1: memref<64x128xbf16, #tpu.memory_space<vmem>>, %arg2: memref<128x128xbf16, #tpu.memory_space<vmem>>, %arg3: memref<1x128xf32, #tpu.memory_space<vmem>>, %arg4: memref<64x128xbf16, #tpu.memory_space<vmem>>) attributes {dimension_semantics = [#tpu.dimension_semantics<parallel>], iteration_bounds = array<i64: 2>, scalar_prefetch = 0 : i64, scratch_operands = 0 : i64, tpu.core_type = #tpu.core_type<tc>, window_params = [{transform_indices = @transform_0, window_bounds = array<i64: 64, 128>}, {pipeline_mode = #tpu.pipeline_mode<synchronous>, transform_indices = @transform_1, window_bounds = array<i64: 128, 128>}, {pipeline_mode = #tpu.pipeline_mode<synchronous>, transform_indices = @transform_2, window_bounds = array<i64: 1, 128>}, {transform_indices = @transform_3, window_bounds = array<i64: 64, 128>}]} {
    %c0 = arith.constant 0 : index
    %c0_0 = arith.constant 0 : index
    %0 = vector.load %arg1[%c0, %c0_0] : memref<64x128xbf16, #tpu.memory_space<vmem>>, vector<64x128xbf16>
    %c0_1 = arith.constant 0 : index
    %c0_2 = arith.constant 0 : index
    %1 = vector.load %arg2[%c0_1, %c0_2] : memref<128x128xbf16, #tpu.memory_space<vmem>>, vector<128x128xbf16>
    %cst = arith.constant dense<0.000000e+00> : vector<64x128xf32>
    %2 = tpu.matmul %0, %1, %cst {dimension_numbers = #tpu.dot_dimension_numbers<[1], [0], [0], [1], [0, 0, 1, 1], [], []>} : vector<64x128xbf16>, vector<128x128xbf16>, vector<64x128xf32> -> vector<64x128xf32>
    %c0_3 = arith.constant 0 : index
    %c0_4 = arith.constant 0 : index
    %3 = vector.load %arg3[%c0_3, %c0_4] : memref<1x128xf32, #tpu.memory_space<vmem>>, vector<1x128xf32>
    %4 = vector.broadcast %3 : vector<1x128xf32> to vector<64x128xf32>
    %5 = arith.addf %2, %4 : vector<64x128xf32>
    %cst_5 = arith.constant 0.000000e+00 : f32
    %6 = vector.broadcast %cst_5 : f32 to vector<64x128xf32>
    %7 = arith.maximumf %5, %6 : vector<64x128xf32>
    %8 = arith.truncf %7 : vector<64x128xf32> to vector<64x128xbf16>
    %c0_6 = arith.constant 0 : index
    %c0_7 = arith.constant 0 : index
    %9 = vector.load %arg4[%c0_6, %c0_7] : memref<64x128xbf16, #tpu.memory_space<vmem>>, vector<64x128xbf16>
    tpu.vector_store %arg4[%c0_6, %c0_7], %8 {strides = array<i32>} : memref<64x128xbf16, #tpu.memory_space<vmem>>, vector<64x128xbf16>,
    return
  }
  func.func @transform_0(%arg0: i32) -> (i32, i32) {
    %c0_i32 = arith.constant 0 : i32
    %c0_i32_0 = arith.constant 0 : i32
    return %arg0, %c0_i32 : i32, i32
  }
  func.func @transform_1(%arg0: i32) -> (i32, i32) {
    %c0_i32 = arith.constant 0 : i32
    %c0_i32_0 = arith.constant 0 : i32
    %c0_i32_1 = arith.constant 0 : i32
    return %c0_i32, %c0_i32_0 : i32, i32
  }
  func.func @transform_2(%arg0: i32) -> (i32, i32) {
    %c0_i32 = arith.constant 0 : i32
    %c0_i32_0 = arith.constant 0 : i32
    %c0_i32_1 = arith.constant 0 : i32
    return %c0_i32, %c0_i32_0 : i32, i32
  }
  func.func @transform_3(%arg0: i32) -> (i32, i32) {
    %c0_i32 = arith.constant 0 : i32
    %c0_i32_0 = arith.constant 0 : i32
    return %arg0, %c0_i32 : i32, i32
  }
}

module attributes {stable_mosaic.version = 11 : i64} {
  func.func @_agg_logsoftmax_kernel(%arg0: i32, %arg1: memref<64x128xbf16, #tpu.memory_space<vmem>>, %arg2: memref<128x128xbf16, #tpu.memory_space<vmem>>, %arg3: memref<1x128xf32, #tpu.memory_space<vmem>>, %arg4: memref<64x128xf32, #tpu.memory_space<vmem>>) attributes {dimension_semantics = [#tpu.dimension_semantics<parallel>], iteration_bounds = array<i64: 2>, scalar_prefetch = 0 : i64, scratch_operands = 0 : i64, tpu.core_type = #tpu.core_type<tc>, window_params = [{transform_indices = @transform_0, window_bounds = array<i64: 64, 128>}, {pipeline_mode = #tpu.pipeline_mode<synchronous>, transform_indices = @transform_1, window_bounds = array<i64: 128, 128>}, {pipeline_mode = #tpu.pipeline_mode<synchronous>, transform_indices = @transform_2, window_bounds = array<i64: 1, 128>}, {transform_indices = @transform_3, window_bounds = array<i64: 64, 128>}]} {
    %c0 = arith.constant 0 : index
    %c0_0 = arith.constant 0 : index
    %0 = vector.load %arg1[%c0, %c0_0] : memref<64x128xbf16, #tpu.memory_space<vmem>>, vector<64x128xbf16>
    %c0_1 = arith.constant 0 : index
    %c0_2 = arith.constant 0 : index
    %1 = vector.load %arg2[%c0_1, %c0_2] : memref<128x128xbf16, #tpu.memory_space<vmem>>, vector<128x128xbf16>
    %cst = arith.constant dense<0.000000e+00> : vector<64x128xf32>
    %2 = tpu.matmul %0, %1, %cst {dimension_numbers = #tpu.dot_dimension_numbers<[1], [0], [0], [1], [0, 0, 1, 1], [], []>} : vector<64x128xbf16>, vector<128x128xbf16>, vector<64x128xf32> -> vector<64x128xf32>
    %c0_3 = arith.constant 0 : index
    %c0_4 = arith.constant 0 : index
    %3 = vector.load %arg3[%c0_3, %c0_4] : memref<1x128xf32, #tpu.memory_space<vmem>>, vector<1x128xf32>
    %4 = vector.broadcast %3 : vector<1x128xf32> to vector<64x128xf32>
    %5 = arith.addf %2, %4 : vector<64x128xf32>
    %6 = tpu.iota {dimensions = array<i32: 1>} : vector<64x128xi32>
    %c8_i32 = arith.constant 8 : i32
    %7 = vector.broadcast %c8_i32 : i32 to vector<64x128xi32>
    %8 = arith.cmpi slt, %6, %7 : vector<64x128xi32>
    %cst_5 = arith.constant -1.000000e+30 : f32
    %9 = vector.broadcast %cst_5 : f32 to vector<64x128xf32>
    %10 = arith.select %8, %5, %9 : vector<64x128xi1>, vector<64x128xf32>
    %cst_6 = arith.constant dense<0xFF800000> : vector<64xf32>
    %11 = vector.multi_reduction <maximumf>, %10, %cst_6 [1] : vector<64x128xf32> to vector<64xf32>
    %12 = vector.shape_cast %11 : vector<64xf32> to vector<64x1xf32>
    %13 = vector.broadcast %12 : vector<64x1xf32> to vector<64x128xf32>
    %14 = arith.subf %10, %13 : vector<64x128xf32>
    %15 = math.exp %14 : vector<64x128xf32>
    %cst_7 = arith.constant dense<0.000000e+00> : vector<64xf32>
    %16 = vector.multi_reduction <add>, %15, %cst_7 [1] : vector<64x128xf32> to vector<64xf32>
    %17 = vector.shape_cast %16 : vector<64xf32> to vector<64x1xf32>
    %18 = math.log %17 : vector<64x1xf32>
    %19 = vector.broadcast %18 : vector<64x1xf32> to vector<64x128xf32>
    %20 = arith.subf %14, %19 : vector<64x128xf32>
    %c0_8 = arith.constant 0 : index
    %c0_9 = arith.constant 0 : index
    %21 = vector.load %arg4[%c0_8, %c0_9] : memref<64x128xf32, #tpu.memory_space<vmem>>, vector<64x128xf32>
    tpu.vector_store %arg4[%c0_8, %c0_9], %20 {strides = array<i32>} : memref<64x128xf32, #tpu.memory_space<vmem>>, vector<64x128xf32>,
    return
  }
  func.func @transform_0(%arg0: i32) -> (i32, i32) {
    %c0_i32 = arith.constant 0 : i32
    %c0_i32_0 = arith.constant 0 : i32
    return %arg0, %c0_i32 : i32, i32
  }
  func.func @transform_1(%arg0: i32) -> (i32, i32) {
    %c0_i32 = arith.constant 0 : i32
    %c0_i32_0 = arith.constant 0 : i32
    %c0_i32_1 = arith.constant 0 : i32
    return %c0_i32, %c0_i32_0 : i32, i32
  }
  func.func @transform_2(%arg0: i32) -> (i32, i32) {
    %c0_i32 = arith.constant 0 : i32
    %c0_i32_0 = arith.constant 0 : i32
    %c0_i32_1 = arith.constant 0 : i32
    return %c0_i32, %c0_i32_0 : i32, i32
  }
  func.func @transform_3(%arg0: i32) -> (i32, i32) {
    %c0_i32 = arith.constant 0 : i32
    %c0_i32_0 = arith.constant 0 : i32
    return %arg0, %c0_i32 : i32, i32
  }
}

</mosaic_0001>

<bundles_post_ra>
// kernel: gcn_forward.3
= control target key start
LH: loop header
LB: loop body
LE: loop exit
PB: predicated region body
PF: predicated region fallthrough
CT: control target
= control target key end

     0   :  { %s654_s12 = smov 0   ;;  %s758_s0 = inlined_call_operand.vmem [shape: bf16[128,128], index: 0, kind: input, shape index: {}]   ;;  %s759_s1 = inlined_call_operand.vmem [shape: bf16[128,128], index: 1, kind: input, shape index: {}]   ;;  %s760_s2 = inlined_call_operand.vmem [shape: f32[1,128], index: 2, kind: input, shape index: {}]   ;;  %s761_s3 = inlined_call_operand.vmem [shape: f32[128,128], index: 3, kind: output, shape index: {}]  }
   0x1 LB: > { %s498_s13 = sadd.s32 4294967295, %s632_s12   ;;  %p502_p0 = scmp.ge.s32.totalorder %s632_s12, 1  ;;  %s632_s12 = sphi %s654_s12, %s13_s12  }
   0x2   : > { %p138_p1 = scmp.lt.s32.totalorder %s632_s12, 3 }
   0x4   : > { %p139_p2 = pnand %p502_p0, %p138_p1 }
   0x5   : > { %v582_v0 = vld [vmem:[%s759_s1] sm:$0xff] (!%p139_p2)   ;;  %s503_s16 = sshll.u32 (!%p139_p2), %s498_s13, 3  ;;  %v583_v1 = vld [vmem:[%s759_s1 + $0x8] sm:$0xff] (!%p139_p2)   ;;  %v584_v2 = vld [vmem:[%s759_s1 + $0x10] sm:$0xff] (!%p139_p2)   ;;  %v343_v12 = vlaneseq (!%p139_p2) }
   0x6   : > { %142 = sbr.rel (%p139_p2) target bundleno = 585 (0x249), region = 32  ;;  %p163_p3 = scmp.lt.s32.totalorder (!%p139_p2), %s503_s16, 15  ;;  %534 = vmatprep.subr.bf16.mxu0 (!%p139_p2), %v582_v0  ;;  %558 = vmatprep.subr.bf16.mxu1 (!%p139_p2), %v582_v0  ;;  %v585_v3 = vld [vmem:[%s759_s1 + $0x18] sm:$0xff] (!%p139_p2)   ;;  %v586_v6 = vld [vmem:[%s759_s1 + $0x20] sm:$0xff] (!%p139_p2)   ;;  %v587_v7 = vld [vmem:[%s759_s1 + $0x28] sm:$0xff] (!%p139_p2)  }
   0x7   : > { %535 = vmatpush3.bf16.msra.mxu0 (!%p139_p2), %v582_v0  ;;  %566 = vmatpush3.bf16.msra.mxu1 (!%p139_p2), %v582_v0  ;;  %v588_v8 = vld [vmem:[%s759_s1 + $0x30] sm:$0xff] (!%p139_p2)   ;;  %v589_v9 = vld [vmem:[%s759_s1 + $0x38] sm:$0xff] (!%p139_p2)   ;;  %v344_v13 = vand.u32 (!%p139_p2), 127, %v343_v12  ;;  %v507_v14 = vld [vmem:[%s760_s2] ss:$0 sm:$0xff] (!%p139_p2) }
   0x8   : > { %536 = vmatprep.subr.bf16.mxu0 (!%p139_p2), %v583_v1  ;;  %559 = vmatprep.subr.bf16.mxu1 (!%p139_p2), %v583_v1 }
   0x9   : > { %vm345_vm0 = vcmp.lt.s32.totalorder (!%p139_p2), %v344_v13, 8 }
   0xb   : > { %537 = vmatpush3.bf16.msra.mxu0 (!%p139_p2), %v583_v1  ;;  %567 = vmatpush3.bf16.msra.mxu1 (!%p139_p2), %v583_v1 }
   0xc   : > { %538 = vmatprep.subr.bf16.mxu0 (!%p139_p2), %v584_v2  ;;  %560 = vmatprep.subr.bf16.mxu1 (!%p139_p2), %v584_v2 }
   0xd   : > { %s763_s16 = smov (!%p163_p3, %s503_s16), 15 }
   0xe   : > { %s504_s21 = sshll.u32 %s763_s16, 2  ;;  %s506_s10 = sshll.u32 %s763_s16, 3 }
   0xf   : > { %s677_s24 = scalar_lea.vmem %s758_s0, %s504_s21  ;;  %539 = vmatpush3.bf16.msra.mxu0 %v584_v2  ;;  %568 = vmatpush3.bf16.msra.mxu1 %v584_v2  ;;  %s737_s14 = scalar_lea.vmem %s761_s3, %s506_s10 }
  0x10   : > { %v590_v4 = vld [vmem:[%s677_s24] sm:$0xff]   ;;  %v592_v5 = vld [vmem:[%s677_s24 + $0x10] sm:$0xff]   ;;  %540 = vmatprep.subr.bf16.mxu0 %v585_v3  ;;  %561 = vmatprep.subr.bf16.mxu1 %v585_v3  ;;  %v591_v10 = vld [vmem:[%s677_s24 + $0x8] sm:$0xff]  }
  0x11   : > { %550 = vmatprep.mubr.bf16.mxu0 %v590_v4  ;;  %554 = vmatprep.mubr.bf16.mxu1 %v592_v5  ;;  %v593_v11 = vld [vmem:[%s677_s24 + $0x18] sm:$0xff]  }
  0x13   : > { %541 = vmatpush3.bf16.msra.mxu0 %v585_v3  ;;  %569 = vmatpush3.bf16.msra.mxu1 %v585_v3 }
  0x14   : > { %542 = vmatprep.subr.bf16.mxu0 %v586_v6  ;;  %562 = vmatprep.subr.bf16.mxu1 %v586_v6 }
  0x17   : > { %543 = vmatpush3.bf16.msra.mxu0 %v586_v6  ;;  %570 = vmatpush3.bf16.msra.mxu1 %v586_v6 }
  0x18   : > { %544 = vmatprep.subr.bf16.mxu0 %v587_v7  ;;  %563 = vmatprep.subr.bf16.mxu1 %v587_v7 }
  0x1b   : > { %545 = vmatpush3.bf16.msra.mxu0 %v587_v7  ;;  %571 = vmatpush3.bf16.msra.mxu1 %v587_v7 }
  0x1c   : > { %546 = vmatprep.subr.bf16.mxu0 %v588_v8  ;;  %564 = vmatprep.subr.bf16.mxu1 %v588_v8 }
  0x1f   : > { %547 = vmatpush3.bf16.msra.mxu0 %v588_v8  ;;  %572 = vmatpush3.bf16.msra.mxu1 %v588_v8 }
  0x20   : > { %548 = vmatprep.subr.bf16.mxu0 %v589_v9  ;;  %565 = vmatprep.subr.bf16.mxu1 %v589_v9 }
  0x23   : > { %549 = vmatpush3.bf16.msra.mxu0 %v589_v9  ;;  %573 = vmatpush3.bf16.msra.mxu1 %v589_v9 }
  0x26   : > { %551 = vmatmul.mubr.bf16.vlgmr.msra.gmra.mrb[0].mxu0 %v591_v10  ;;  %555 = vmatmul.mubr.bf16.vlgmr.msra.gmra.mrb[0].mxu1 %v593_v11 }
  0xf9   : > { %v552_v15 = vpop.f32.mrb[0].mxu0  ;;  %v556_v16 = vpop.f32.mrb[0].mxu1 }
  0xfa   : > { %v321_v17 = vadd.f32 %v552_v15, %v507_v14  ;;  %v312_v18 = vpop.f32.mrb[1].mxu0  ;;  %v328_v19 = vpop.f32.mrb[1].mxu1  ;;  %v337_v35 = vadd.f32 %v556_v16, %v507_v14 }
  0xfb   : > { %v313_v20 = vadd.f32 %v507_v14, %v312_v18  ;;  %v553_v21 = vpop.f32.mrb[2].mxu0  ;;  %v329_v22 = vadd.f32 %v507_v14, %v328_v19  ;;  %v557_v23 = vpop.f32.mrb[2].mxu1 }
  0xfc   : > { %v324_v24 = vadd.f32 %v553_v21, %v507_v14  ;;  %v315_v25 = vpop.f32.mrb[3].mxu0  ;;  %v331_v26 = vpop.f32.mrb[3].mxu1  ;;  %v348_v27 = vsel %vm345_vm0, %v321_v17, -1e+30  ;;  %v340_v33 = vadd.f32 %v557_v23, %v507_v14  ;;  %v352_v38 = vsel %vm345_vm0, %v337_v35, -1e+30 }
  0xfd   : > { %358 = vmax.xlane.f32.xlu1 %v348_v27  ;;  %v346_v28 = vsel %vm345_vm0, %v313_v20, -1e+30  ;;  %v350_v29 = vsel %vm345_vm0, %v329_v22, -1e+30  ;;  %v332_v30 = vadd.f32 %v507_v14, %v331_v26  ;;  %v316_v32 = vadd.f32 %v507_v14, %v315_v25 }
  0xfe   : > { %354 = vmax.xlane.f32.xlu0 %v346_v28  ;;  %v349_v31 = vsel %vm345_vm0, %v324_v24, -1e+30  ;;  %v353_v37 = vsel %vm345_vm0, %v340_v33, -1e+30 }
  0xff   : > { %v351_v34 = vsel %vm345_vm0, %v332_v30, -1e+30  ;;  %v347_v36 = vsel %vm345_vm0, %v316_v32, -1e+30 }
 0x101   : > { %360 = vmax.xlane.f32.xlu1 %v349_v31 }
 0x102   : > { %362 = vmax.xlane.f32.xlu0 %v350_v29 }
 0x105   : > { %364 = vmax.xlane.f32.xlu1 %v351_v34 }
 0x106   : > { %356 = vmax.xlane.f32.xlu0 %v347_v36 }
 0x109   : > { %368 = vmax.xlane.f32.xlu1 %v353_v37 }
 0x10a   : > { %366 = vmax.xlane.f32.xlu0 %v352_v38 }
 0x18a   : > { %v359_v39 = vpop.xlane.xlu1 %358 }
 0x18b   : > { %v709_v40 = vsub.f32 %v348_v27, %v359_v39  ;;  %v355_v41 = vpop.xlane.xlu0 %354 }
 0x18c   : > { %v711_v42 = vsub.f32 %v346_v28, %v355_v41 }
 0x18d   : > { %v382_v43 = vmul.f32 1.442695, %v709_v40 }
 0x18e   : > { %v378_v44 = vmul.f32 1.442695, %v711_v42  ;;  %v361_v45 = vpop.xlane.xlu1 %360 }
 0x18f   : > { %594 = vpow2.f32 %v382_v43  ;;  %v715_v46 = vsub.f32 %v349_v31, %v361_v45  ;;  %v363_v47 = vpop.xlane.xlu0 %362 }
 0x190   : > { %v717_v48 = vsub.f32 %v350_v29, %v363_v47  ;;  %596 = vpow2.f32 %v378_v44 }
 0x191   : > { %v384_v49 = vmul.f32 1.442695, %v715_v46 }
 0x192   : > { %v365_v50 = vpop.xlane.xlu1 %364  ;;  %v386_v51 = vmul.f32 1.442695, %v717_v48 }
 0x193   : > { %598 = vpow2.f32 %v384_v49  ;;  %v721_v52 = vsub.f32 %v351_v34, %v365_v50  ;;  %v357_v53 = vpop.xlane.xlu0 %356 }
 0x194   : > { %v723_v54 = vsub.f32 %v347_v36, %v357_v53  ;;  %600 = vpow2.f32 %v386_v51 }
 0x195   : > { %v388_v57 = vmul.f32 1.442695, %v721_v52 }
 0x196   : > { %v380_v55 = vmul.f32 1.442695, %v723_v54  ;;  %v369_v56 = vpop.xlane.xlu1 %368 }
 0x197   : > { %v367_v58 = vpop.xlane.xlu0 %366  ;;  %v727_v59 = vsub.f32 %v353_v37, %v369_v56 }
 0x198   : > { %602 = vpow2.f32 %v380_v55  ;;  %v729_v60 = vsub.f32 %v352_v38, %v367_v58 }
 0x199   : > { %v595_v61 = vpop.eup %594  ;;  %604 = vpow2.f32 %v388_v57  ;;  %v392_v0 = vmul.f32 1.442695, %v727_v59 }
 0x19a   : > { %v390_v62 = vmul.f32 1.442695, %v729_v60  ;;  %398 = vadd.xlane.f32.xlu0 %v595_v61  ;;  %v597_v63 = vpop.eup %596 }
 0x19c   : > { %606 = vpow2.f32 %v390_v62 }
 0x19d   : > { %v599_v1 = vpop.eup %598  ;;  %608 = vpow2.f32 %v392_v0 }
 0x19e   : > { %400 = vadd.xlane.f32.xlu1 %v599_v1  ;;  %394 = vadd.xlane.f32.xlu0 %v597_v63  ;;  %v601_v2 = vpop.eup %600 }
 0x1a2   : > { %v603_v3 = vpop.eup %602  ;;  %402 = vadd.xlane.f32.xlu0 %v601_v2 }
 0x1a3   : > { %396 = vadd.xlane.f32.xlu1 %v603_v3  ;;  %v605_v4 = vpop.eup %604 }
 0x1a6   : > { %v607_v5 = vpop.eup %606 }
 0x1a7   : > { %404 = vadd.xlane.f32.xlu1 %v605_v4  ;;  %406 = vadd.xlane.f32.xlu0 %v607_v5  ;;  %v609_v6 = vpop.eup %608 }
 0x1ab   : > { %408 = vadd.xlane.f32.xlu1 %v609_v6 }
 0x227   : > { %v399_v7 = vpop.xlane.xlu0 %398 }
 0x228   : > { %610 = vlog2.f32 %v399_v7 }
 0x22b   : > { %v401_v8 = vpop.xlane.xlu1 %400  ;;  %v395_v9 = vpop.xlane.xlu0 %394 }
 0x22c   : > { %612 = vlog2.f32 %v401_v8 }
 0x22d   : > { %614 = vlog2.f32 %v395_v9 }
 0x22f   : > { %v403_v10 = vpop.xlane.xlu0 %402 }
 0x230   : > { %616 = vlog2.f32 %v403_v10  ;;  %v397_v11 = vpop.xlane.xlu1 %396 }
 0x231   : > { %618 = vlog2.f32 %v397_v11 }
 0x232   : > { %v611_v12 = vpop.eup %610 }
 0x233   : > { %v415_v13 = vmul.f32 0.6931472, %v611_v12 }
 0x234   : > { %v405_v14 = vpop.xlane.xlu1 %404  ;;  %v407_v15 = vpop.xlane.xlu0 %406 }
 0x235   : > { %v428_v16 = vsub.f32 %v709_v40, %v415_v13  ;;  %620 = vlog2.f32 %v405_v14 }
 0x236   : > { %v613_v17 = vpop.eup %612  ;;  %622 = vlog2.f32 %v407_v15 }
 0x237   : > { %v615_v18 = vpop.eup %614  ;;  %436 = vst [vmem:[%s737_s14 + $0x10] sm:$0xff] %v428_v16  ;;  %v417_v19 = vmul.f32 0.6931472, %v613_v17 }
 0x238   : > { %v411_v20 = vmul.f32 0.6931472, %v615_v18  ;;  %v409_v21 = vpop.xlane.xlu1 %408 }
 0x239   : > { %v429_v22 = vsub.f32 %v715_v46, %v417_v19  ;;  %624 = vlog2.f32 %v409_v21 }
 0x23a   : > { %v617_v23 = vpop.eup %616  ;;  %v426_v24 = vsub.f32 %v711_v42, %v411_v20 }
 0x23b   : > { %v619_v25 = vpop.eup %618  ;;  %437 = vst [vmem:[%s737_s14 + $0x18] sm:$0xff] %v429_v22  ;;  %v419_v26 = vmul.f32 0.6931472, %v617_v23 }
 0x23c   : > { %434 = vst [vmem:[%s737_s14] sm:$0xff] %v426_v24  ;;  %v413_v27 = vmul.f32 0.6931472, %v619_v25 }
 0x23d   : > { %v430_v28 = vsub.f32 %v717_v48, %v419_v26 }
 0x23e   : > { %v427_v29 = vsub.f32 %v723_v54, %v413_v27 }
 0x23f   : > { %v621_v30 = vpop.eup %620  ;;  %438 = vst [vmem:[%s737_s14 + $0x20] sm:$0xff] %v430_v28 }
 0x240   : > { %v623_v31 = vpop.eup %622  ;;  %435 = vst [vmem:[%s737_s14 + $0x8] sm:$0xff] %v427_v29  ;;  %v421_v32 = vmul.f32 0.6931472, %v621_v30 }
 0x241   : > { %v423_v33 = vmul.f32 0.6931472, %v623_v31 }
 0x242   : > { %v431_v34 = vsub.f32 %v721_v52, %v421_v32 }
 0x243   : > { %v625_v35 = vpop.eup %624  ;;  %v432_v36 = vsub.f32 %v729_v60, %v423_v33 }
 0x244   : > { %439 = vst [vmem:[%s737_s14 + $0x28] sm:$0xff] %v431_v34  ;;  %v425_v37 = vmul.f32 0.6931472, %v625_v35 }
 0x245   : > { %440 = vst [vmem:[%s737_s14 + $0x30] sm:$0xff] %v432_v36 }
 0x246   : > { %v433_v38 = vsub.f32 %v727_v59, %v425_v37 }
 0x248   : > { %441 = vst [vmem:[%s737_s14 + $0x38] sm:$0xff] %v433_v38 }
 0x249 PF: > { %s13_s12 = sadd.s32 1, %s632_s12  }
 0x24a   : > { %p10_p4 = scmp.ge.s32.totalorder %s13_s12, 4  }
 0x24c   :  { %12 = sbr.rel (!%p10_p4) target bundleno = 1 (0x1), region = 62 }

// kernel: gcn_forward.2
= control target key start
LH: loop header
LB: loop body
LE: loop exit
PB: predicated region body
PF: predicated region fallthrough
CT: control target
= control target key end

     0   :  { %s539_s12 = smov 0   ;;  %s593_s0 = inlined_call_operand.vmem [shape: bf16[128,128], index: 0, kind: input, shape index: {}]   ;;  %s594_s1 = inlined_call_operand.vmem [shape: bf16[128,128], index: 1, kind: input, shape index: {}]   ;;  %s595_s2 = inlined_call_operand.vmem [shape: f32[1,128], index: 2, kind: input, shape index: {}]   ;;  %s596_s3 = inlined_call_operand.vmem [shape: bf16[128,128], index: 3, kind: output, shape index: {}]  }
   0x1 LB: > { %s415_s13 = sadd.s32 4294967295, %s517_s12   ;;  %p419_p0 = scmp.ge.s32.totalorder %s517_s12, 1  ;;  %s517_s12 = sphi %s539_s12, %s13_s12  }
   0x2   : > { %p138_p1 = scmp.lt.s32.totalorder %s517_s12, 3 }
   0x4   : > { %p139_p2 = pnand %p419_p0, %p138_p1 }
   0x5   : > { %v499_v0 = vld [vmem:[%s594_s1] sm:$0xff] (!%p139_p2)   ;;  %s420_s16 = sshll.u32 (!%p139_p2), %s415_s13, 3  ;;  %v500_v1 = vld [vmem:[%s594_s1 + $0x8] sm:$0xff] (!%p139_p2)   ;;  %v501_v2 = vld [vmem:[%s594_s1 + $0x10] sm:$0xff] (!%p139_p2)   ;;  %s422_s8 = sshll.u32 (!%p139_p2), %s415_s13, 2 }
   0x6   : > { %142 = sbr.rel (%p139_p2) target bundleno = 260 (0x104), region = 32  ;;  %p163_p3 = scmp.lt.s32.totalorder (!%p139_p2), %s420_s16, 15  ;;  %451 = vmatprep.subr.bf16.mxu0 (!%p139_p2), %v499_v0  ;;  %475 = vmatprep.subr.bf16.mxu1 (!%p139_p2), %v499_v0  ;;  %v502_v3 = vld [vmem:[%s594_s1 + $0x18] sm:$0xff] (!%p139_p2)   ;;  %v503_v6 = vld [vmem:[%s594_s1 + $0x20] sm:$0xff] (!%p139_p2)   ;;  %v504_v7 = vld [vmem:[%s594_s1 + $0x28] sm:$0xff] (!%p139_p2)  }
   0x7   : > { %452 = vmatpush3.bf16.msra.mxu0 (!%p139_p2), %v499_v0  ;;  %483 = vmatpush3.bf16.msra.mxu1 (!%p139_p2), %v499_v0  ;;  %v505_v8 = vld [vmem:[%s594_s1 + $0x30] sm:$0xff] (!%p139_p2)   ;;  %v506_v9 = vld [vmem:[%s594_s1 + $0x38] sm:$0xff] (!%p139_p2)   ;;  %p169_p4 = scmp.lt.s32.totalorder (!%p139_p2), %s422_s8, 7  ;;  %v424_v12 = vld [vmem:[%s595_s2] ss:$0 sm:$0xff] (!%p139_p2) }
   0x8   : > { %453 = vmatprep.subr.bf16.mxu0 (!%p139_p2), %v500_v1  ;;  %476 = vmatprep.subr.bf16.mxu1 (!%p139_p2), %v500_v1 }
   0xb   : > { %454 = vmatpush3.bf16.msra.mxu0 (!%p139_p2), %v500_v1  ;;  %484 = vmatpush3.bf16.msra.mxu1 (!%p139_p2), %v500_v1 }
   0xc   : > { %455 = vmatprep.subr.bf16.mxu0 (!%p139_p2), %v501_v2  ;;  %477 = vmatprep.subr.bf16.mxu1 (!%p139_p2), %v501_v2 }
   0xd   : > { %s598_s16 = smov (!%p163_p3, %s420_s16), 15  ;;  %s600_s8 = smov (!%p169_p4, %s422_s8), 7 }
   0xe   : > { %s421_s21 = sshll.u32 %s598_s16, 2  ;;  %s423_s11 = sshll.u32 %s600_s8, 3 }
   0xf   : > { %s561_s24 = scalar_lea.vmem %s593_s0, %s421_s21  ;;  %456 = vmatpush3.bf16.msra.mxu0 %v501_v2  ;;  %485 = vmatpush3.bf16.msra.mxu1 %v501_v2  ;;  %s172_s15 = scalar_lea.vmem %s596_s3, %s423_s11 }
  0x10   : > { %v507_v4 = vld [vmem:[%s561_s24] sm:$0xff]   ;;  %v508_v5 = vld [vmem:[%s561_s24 + $0x10] sm:$0xff]   ;;  %457 = vmatprep.subr.bf16.mxu0 %v502_v3  ;;  %478 = vmatprep.subr.bf16.mxu1 %v502_v3  ;;  %v509_v10 = vld [vmem:[%s561_s24 + $0x8] sm:$0xff]  }
  0x11   : > { %467 = vmatprep.mubr.bf16.mxu0 %v507_v4  ;;  %471 = vmatprep.mubr.bf16.mxu1 %v508_v5  ;;  %v510_v11 = vld [vmem:[%s561_s24 + $0x18] sm:$0xff]  }
  0x13   : > { %458 = vmatpush3.bf16.msra.mxu0 %v502_v3  ;;  %486 = vmatpush3.bf16.msra.mxu1 %v502_v3 }
  0x14   : > { %459 = vmatprep.subr.bf16.mxu0 %v503_v6  ;;  %479 = vmatprep.subr.bf16.mxu1 %v503_v6 }
  0x17   : > { %460 = vmatpush3.bf16.msra.mxu0 %v503_v6  ;;  %487 = vmatpush3.bf16.msra.mxu1 %v503_v6 }
  0x18   : > { %461 = vmatprep.subr.bf16.mxu0 %v504_v7  ;;  %480 = vmatprep.subr.bf16.mxu1 %v504_v7 }
  0x1b   : > { %462 = vmatpush3.bf16.msra.mxu0 %v504_v7  ;;  %488 = vmatpush3.bf16.msra.mxu1 %v504_v7 }
  0x1c   : > { %463 = vmatprep.subr.bf16.mxu0 %v505_v8  ;;  %481 = vmatprep.subr.bf16.mxu1 %v505_v8 }
  0x1f   : > { %464 = vmatpush3.bf16.msra.mxu0 %v505_v8  ;;  %489 = vmatpush3.bf16.msra.mxu1 %v505_v8 }
  0x20   : > { %465 = vmatprep.subr.bf16.mxu0 %v506_v9  ;;  %482 = vmatprep.subr.bf16.mxu1 %v506_v9 }
  0x23   : > { %466 = vmatpush3.bf16.msra.mxu0 %v506_v9  ;;  %490 = vmatpush3.bf16.msra.mxu1 %v506_v9 }
  0x26   : > { %468 = vmatmul.mubr.bf16.vlgmr.msra.gmra.mrb[0].mxu0 %v509_v10  ;;  %472 = vmatmul.mubr.bf16.vlgmr.msra.gmra.mrb[0].mxu1 %v510_v11 }
  0xf9   : > { %v469_v13 = vpop.f32.mrb[0].mxu0  ;;  %v473_v14 = vpop.f32.mrb[0].mxu1 }
  0xfa   : > { %v321_v15 = vadd.f32 %v469_v13, %v424_v12  ;;  %v337_v16 = vadd.f32 %v473_v14, %v424_v12  ;;  %v312_v17 = vpop.f32.mrb[1].mxu0  ;;  %v328_v18 = vpop.f32.mrb[1].mxu1 }
  0xfb   : > { %v313_v19 = vadd.f32 %v424_v12, %v312_v17  ;;  %v329_v20 = vadd.f32 %v424_v12, %v328_v18  ;;  %v470_v21 = vpop.f32.mrb[2].mxu0  ;;  %v474_v22 = vpop.f32.mrb[2].mxu1 }
  0xfc   : > { %v349_v23 = vmax.f32 %v337_v16, 0.0  ;;  %v324_v24 = vadd.f32 %v470_v21, %v424_v12  ;;  %v340_v25 = vadd.f32 %v474_v22, %v424_v12  ;;  %v315_v26 = vpop.f32.mrb[3].mxu0  ;;  %v331_v27 = vpop.f32.mrb[3].mxu1  ;;  %v345_v31 = vmax.f32 %v321_v15, 0.0 }
  0xfd   : > { %v347_v28 = vmax.f32 %v329_v20, 0.0  ;;  %v316_v29 = vadd.f32 %v424_v12, %v315_v26  ;;  %v332_v30 = vadd.f32 %v424_v12, %v331_v27  ;;  %v343_v34 = vmax.f32 %v313_v19, 0.0 }
  0xfe   : > { %v346_v32 = vmax.f32 %v324_v24, 0.0  ;;  %v350_v33 = vmax.f32 %v340_v25, 0.0 }
  0xff   : > { %v344_v35 = vmax.f32 %v316_v29, 0.0  ;;  %v348_v36 = vmax.f32 %v332_v30, 0.0 }
 0x100   : > { %v352_v37 = vpack.c.bf16 %v346_v32, %v345_v31  ;;  %v354_v38 = vpack.c.bf16 %v350_v33, %v349_v23 }
 0x101   : > { %v351_v39 = vpack.c.bf16 %v344_v35, %v343_v34  ;;  %v353_v40 = vpack.c.bf16 %v348_v36, %v347_v28 }
 0x102   : > { %356 = vst [vmem:[%s172_s15 + $0x8] sm:$0xff] %v352_v37  ;;  %358 = vst [vmem:[%s172_s15 + $0x18] sm:$0xff] %v354_v38 }
 0x103   : > { %355 = vst [vmem:[%s172_s15] sm:$0xff] %v351_v39  ;;  %357 = vst [vmem:[%s172_s15 + $0x10] sm:$0xff] %v353_v40 }
 0x104 PF: > { %s13_s12 = sadd.s32 1, %s517_s12  }
 0x105   : > { %p10_p5 = scmp.ge.s32.totalorder %s13_s12, 4  }
 0x107   :  { %12 = sbr.rel (!%p10_p5) target bundleno = 1 (0x1), region = 62 }

</bundles_post_ra>
